<compile_context>
chip_gen: v6e
topology: v6e:2x2x1
jax: 0.10.0
libtpu: 0.0.40
codegen_flags: <defaults>
</compile_context>

<pallas_src>
import jax
import jax.numpy as jnp
from jax.experimental import pallas as pl
from jax.experimental.pallas import tpu as pltpu

# ---------------- configuration (small synthetic shapes) ----------------
B = 2            # batch
T = 24           # history length
N = 16           # number of nodes
C = 3            # input channels (value, time-of-day, day-of-week)
TIME_NUM = 12    # time_of_day_size
OUT_DIM = 12     # prediction horizon
F_PRE = 32       # feature dim of the (stand-in) BigSTPreprocess extractor
HID = 32         # hidden dim of the (stand-in) bigst backbone
PERIOD_LEN = 12  # window length used inside sample_period

M = B * N        # total rows (independent node histories)
K_IN = T * C     # flattened per-node history length (channel-major)
F_MID = HID + F_PRE + OUT_DIM   # packed intermediate width (32+32+12 = 76)


def _round_up(a, b):
    return ((a + b - 1) // b) * b


# row-tile geometry --------------------------------------------------------
ROW_TILE_TARGET = 1024              # big tiles: ~85% of HBM roofline vs 63% at 256
M_PAD = _round_up(M, 8)
ROW_TILE = min(ROW_TILE_TARGET, M_PAD)
M_PAD = _round_up(M_PAD, ROW_TILE)  # no silently dropped rows
GRID_ROWS = M_PAD // ROW_TILE
# v7x has 2 TensorCores: a 1-step grid leaves one idle.  Split when possible.
if GRID_ROWS == 1 and ROW_TILE >= 16 and ROW_TILE % 16 == 0:
    ROW_TILE //= 2
    GRID_ROWS = 2


def _period_starts(history_length, time_num):
    # mirrors: [idx_list[i:i+12] for i in range(0, history_length, time_num)]
    # torch.stack requires every window to have length 12; ragged trailing
    # windows would make the original code error, so reject them here too.
    starts = tuple(range(0, history_length, time_num))
    for s in starts:
        assert s + PERIOD_LEN <= history_length, (
            "sample_period would produce a ragged window (torch.stack errors)")
    assert starts, "history length too short for sample_period"
    return starts


# ---------------------------- fused Pallas kernel ----------------------------
def fused_bigst_kernel(x_ref, w1_ref, b1_ref, w2_ref, breg_ref, o_ref):
    """One row-tile of the whole BigST forward (two MXU passes).

    x_ref:  (ROW_TILE, K_IN)  channel-major per-node history
            [value_0..value_{T-1}, tod_0.., dow_0..].
    w1_ref: (K_IN, F_MID)     packed [w_enc | w_pre | A @ w_reg_f_per].
    w2_ref: (F_MID, OUT_DIM)  packed [w_reg_x ; w_reg_f_pre ; I].
    o_ref:  (ROW_TILE, OUT_DIM) prediction.
    """
    x = x_ref[...]                                              # (tile, K_IN)

    # pass 1: encoder pre-activation | preprocess features | period features
    h = (jnp.dot(x, w1_ref[...], preferred_element_type=jnp.float32)
         + b1_ref[...])                                         # (tile, F_MID)

    # ReLU only on the encoder columns (< HID); feat_pre / period pass through.
    col = jax.lax.broadcasted_iota(jnp.int32, h.shape, 1)
    h = jnp.where(col < HID, jnp.maximum(h, 0.0), h)

    # pass 2: fused regression head over [relu(h) | feat_pre | feat_period@Wper]
    o_ref[...] = (jnp.dot(h, w2_ref[...], preferred_element_type=jnp.float32)
                  + breg_ref[...])                              # (tile, OUT_DIM)


def _full_spec(arr):
    """Whole array as one VMEM-resident block (constant index map)."""
    return pl.BlockSpec(arr.shape, lambda i: (0,) * arr.ndim)


# ------------------------------- model ---------------------------------
def init_params(seed=0):
    key = jax.random.PRNGKey(seed)
    ks = jax.random.split(key, 7)
    scale = 0.05
    return {
        # stand-in BigSTPreprocess (frozen feature extractor)
        "w_pre": scale * jax.random.normal(ks[0], (K_IN, F_PRE), jnp.float32),
        "b_pre": scale * jax.random.normal(ks[1], (1, F_PRE), jnp.float32),
        # stand-in bigst backbone + regression head
        "w_enc": scale * jax.random.normal(ks[2], (K_IN, HID), jnp.float32),
        "b_enc": scale * jax.random.normal(ks[3], (1, HID), jnp.float32),
        "w_reg_x": scale * jax.random.normal(ks[4], (HID, OUT_DIM), jnp.float32),
        # regression over cat([feat_pre, feat_period]) split into two pieces
        "w_reg_f_pre": scale * jax.random.normal(ks[5], (F_PRE, OUT_DIM),
                                                 jnp.float32),
        "w_reg_f_per": scale * jax.random.normal(ks[6], (PERIOD_LEN, OUT_DIM),
                                                 jnp.float32),
        "b_reg": jnp.zeros((1, OUT_DIM), jnp.float32),
    }


def pack_params(params):
    """Host-side weight packing (done once, outside the hot path).

    A is the (K_IN, PERIOD_LEN) averaging matrix of sample_period placed in the
    value-channel rows (first T rows of the channel-major slab), so that
    x_flat @ A == feat_period exactly.
    """
    starts = _period_starts(T, TIME_NUM)
    n_win = float(len(starts))
    a = jnp.zeros((K_IN, PERIOD_LEN), jnp.float32)
    eye_win = jnp.eye(PERIOD_LEN, dtype=jnp.float32) / n_win
    for s in starts:
        a = a.at[s:s + PERIOD_LEN, :].add(eye_win)

    w1 = jnp.concatenate(
        [params["w_enc"], params["w_pre"], a @ params["w_reg_f_per"]], axis=1)
    b1 = jnp.concatenate(
        [params["b_enc"], params["b_pre"],
         jnp.zeros((1, OUT_DIM), jnp.float32)], axis=1)
    w2 = jnp.concatenate(
        [params["w_reg_x"], params["w_reg_f_pre"],
         jnp.eye(OUT_DIM, dtype=jnp.float32)], axis=0)
    assert w1.shape == (K_IN, F_MID) and w2.shape == (F_MID, OUT_DIM)
    return {"w1": w1, "b1": b1, "w2": w2, "b_reg": params["b_reg"]}


@jax.jit
def bigst_forward(history_data, packed):
    """history_data: (B, T, N, C) float32 -> prediction (B, OUT_DIM, N, 1)."""
    # history_data.transpose(1, 2) + channel-major per-node flatten, in ONE
    # transpose: (B,T,N,C) -> (B,N,C,T) -> (M, C*T).  Value channel = first T
    # columns (needed so the folded sample_period matrix lands on it).
    x_flat = jnp.transpose(history_data, (0, 2, 3, 1)).reshape(M, K_IN)
    if M_PAD > M:
        x_flat = jnp.pad(x_flat, ((0, M_PAD - M), (0, 0)))

    out = pl.pallas_call(
        fused_bigst_kernel,
        out_shape=jax.ShapeDtypeStruct((M_PAD, OUT_DIM), jnp.float32),
        grid=(GRID_ROWS,),
        in_specs=[
            pl.BlockSpec((ROW_TILE, K_IN), lambda i: (i, 0)),   # x rows
            _full_spec(packed["w1"]), _full_spec(packed["b1"]),
            _full_spec(packed["w2"]), _full_spec(packed["b_reg"]),
        ],
        out_specs=pl.BlockSpec((ROW_TILE, OUT_DIM), lambda i: (i, 0)),
        compiler_params=pltpu.CompilerParams(
            dimension_semantics=("parallel",)),   # rows shard across TCs
    )(x_flat, packed["w1"], packed["b1"], packed["w2"], packed["b_reg"])

    out = out[:M].reshape(B, N, OUT_DIM)
    return jnp.transpose(out, (0, 2, 1))[..., None]              # (B, OUT, N, 1)


# pure-JAX reference for correctness checking ------------------------------
def reference_forward(history_data, params):
    x = jnp.transpose(history_data, (0, 2, 1, 3))               # (B, N, T, C)
    x_flat = jnp.transpose(x, (0, 1, 3, 2)).reshape(M, C * T)
    feat_pre = x_flat @ params["w_pre"] + params["b_pre"]
    starts = _period_starts(T, TIME_NUM)
    feat_period = jnp.mean(
        jnp.stack([x[:, :, s:s + PERIOD_LEN, 0] for s in starts], axis=0),
        axis=0).reshape(M, PERIOD_LEN)
    h = jnp.maximum(x_flat @ params["w_enc"] + params["b_enc"], 0.0)
    out = (h @ params["w_reg_x"]
           + feat_pre @ params["w_reg_f_pre"]
           + feat_period @ params["w_reg_f_per"]
           + params["b_reg"])
    out = out.reshape(B, N, OUT_DIM)
    return jnp.transpose(out, (0, 2, 1))[..., None]


# -------------------------------- main ----------------------------------
if __name__ == "__main__":
    key = jax.random.PRNGKey(0)
    k_val, k_tod, k_dow = jax.random.split(key, 3)
    value = jax.random.normal(k_val, (B, T, N, 1), jnp.float32)
    tod = jax.random.uniform(k_tod, (B, T, N, 1), jnp.float32)           # [0,1)
    dow = jax.random.randint(k_dow, (B, T, N, 1), 0, 7).astype(jnp.float32)
    history_data = jnp.concatenate([value, tod, dow], axis=-1)           # (B,T,N,C)

    params = init_params(seed=0)
    packed = pack_params(params)

    pred = bigst_forward(history_data, packed)
    pred = jax.block_until_ready(pred)

    assert pred.shape == (B, OUT_DIM, N, 1), pred.shape
    assert bool(jnp.all(jnp.isfinite(pred)))

    # check the fused kernel against a pure-JAX reference of the whole forward
    ref = reference_forward(history_data, params)
    assert bool(jnp.allclose(ref, pred, atol=2e-4, rtol=2e-4)), (
        float(jnp.max(jnp.abs(ref - pred))))

    print("KERNEL_OK")
</pallas_src>

<mosaic_0001>
module attributes {stable_mosaic.version = 11 : i64} {
  func.func @fused_bigst_kernel(%arg0: i32, %arg1: memref<16x72xf32, #tpu.memory_space<vmem>>, %arg2: memref<72x76xf32, #tpu.memory_space<vmem>>, %arg3: memref<1x76xf32, #tpu.memory_space<vmem>>, %arg4: memref<76x12xf32, #tpu.memory_space<vmem>>, %arg5: memref<1x12xf32, #tpu.memory_space<vmem>>, %arg6: memref<16x12xf32, #tpu.memory_space<vmem>>) attributes {dimension_semantics = [#tpu.dimension_semantics<parallel>], iteration_bounds = array<i64: 2>, scalar_prefetch = 0 : i64, scratch_operands = 0 : i64, tpu.core_type = #tpu.core_type<tc>, window_params = [{transform_indices = @transform_0, window_bounds = array<i64: 16, 72>}, {pipeline_mode = #tpu.pipeline_mode<synchronous>, transform_indices = @transform_1, window_bounds = array<i64: 72, 76>}, {pipeline_mode = #tpu.pipeline_mode<synchronous>, transform_indices = @transform_2, window_bounds = array<i64: 1, 76>}, {pipeline_mode = #tpu.pipeline_mode<synchronous>, transform_indices = @transform_3, window_bounds = array<i64: 76, 12>}, {pipeline_mode = #tpu.pipeline_mode<synchronous>, transform_indices = @transform_4, window_bounds = array<i64: 1, 12>}, {transform_indices = @transform_5, window_bounds = array<i64: 16, 12>}]} {
    %c0 = arith.constant 0 : index
    %c0_0 = arith.constant 0 : index
    %0 = vector.load %arg1[%c0, %c0_0] : memref<16x72xf32, #tpu.memory_space<vmem>>, vector<16x72xf32>
    %c0_1 = arith.constant 0 : index
    %c0_2 = arith.constant 0 : index
    %1 = vector.load %arg2[%c0_1, %c0_2] : memref<72x76xf32, #tpu.memory_space<vmem>>, vector<72x76xf32>
    %cst = arith.constant dense<0.000000e+00> : vector<16x76xf32>
    %2 = tpu.matmul %0, %1, %cst {dimension_numbers = #tpu.dot_dimension_numbers<[1], [0], [0], [1], [0, 0, 1, 1], [], []>} : vector<16x72xf32>, vector<72x76xf32>, vector<16x76xf32> -> vector<16x76xf32>
    %c0_3 = arith.constant 0 : index
    %c0_4 = arith.constant 0 : index
    %3 = vector.load %arg3[%c0_3, %c0_4] : memref<1x76xf32, #tpu.memory_space<vmem>>, vector<1x76xf32>
    %4 = vector.broadcast %3 : vector<1x76xf32> to vector<16x76xf32>
    %5 = arith.addf %2, %4 : vector<16x76xf32>
    %6 = tpu.iota {dimensions = array<i32: 1>} : vector<16x76xi32>
    %c32_i32 = arith.constant 32 : i32
    %7 = vector.broadcast %c32_i32 : i32 to vector<16x76xi32>
    %8 = arith.cmpi slt, %6, %7 : vector<16x76xi32>
    %cst_5 = arith.constant 0.000000e+00 : f32
    %9 = vector.broadcast %cst_5 : f32 to vector<16x76xf32>
    %10 = arith.maximumf %5, %9 : vector<16x76xf32>
    %11 = arith.select %8, %10, %5 : vector<16x76xi1>, vector<16x76xf32>
    %c0_6 = arith.constant 0 : index
    %c0_7 = arith.constant 0 : index
    %12 = vector.load %arg4[%c0_6, %c0_7] : memref<76x12xf32, #tpu.memory_space<vmem>>, vector<76x12xf32>
    %cst_8 = arith.constant dense<0.000000e+00> : vector<16x12xf32>
    %13 = tpu.matmul %11, %12, %cst_8 {dimension_numbers = #tpu.dot_dimension_numbers<[1], [0], [0], [1], [0, 0, 1, 1], [], []>} : vector<16x76xf32>, vector<76x12xf32>, vector<16x12xf32> -> vector<16x12xf32>
    %c0_9 = arith.constant 0 : index
    %c0_10 = arith.constant 0 : index
    %14 = vector.load %arg5[%c0_9, %c0_10] : memref<1x12xf32, #tpu.memory_space<vmem>>, vector<1x12xf32>
    %15 = vector.broadcast %14 : vector<1x12xf32> to vector<16x12xf32>
    %16 = arith.addf %13, %15 : vector<16x12xf32>
    %c0_11 = arith.constant 0 : index
    %c0_12 = arith.constant 0 : index
    %17 = vector.load %arg6[%c0_11, %c0_12] : memref<16x12xf32, #tpu.memory_space<vmem>>, vector<16x12xf32>
    tpu.vector_store %arg6[%c0_11, %c0_12], %16 {strides = array<i32>} : memref<16x12xf32, #tpu.memory_space<vmem>>, vector<16x12xf32>,
    return
  }
  func.func @transform_0(%arg0: i32) -> (i32, i32) {
    %c0_i32 = arith.constant 0 : i32
    %c0_i32_0 = arith.constant 0 : i32
    return %arg0, %c0_i32 : i32, i32
  }
  func.func @transform_1(%arg0: i32) -> (i32, i32) {
    %c0_i32 = arith.constant 0 : i32
    %c0_i32_0 = arith.constant 0 : i32
    %c0_i32_1 = arith.constant 0 : i32
    return %c0_i32, %c0_i32_0 : i32, i32
  }
  func.func @transform_2(%arg0: i32) -> (i32, i32) {
    %c0_i32 = arith.constant 0 : i32
    %c0_i32_0 = arith.constant 0 : i32
    %c0_i32_1 = arith.constant 0 : i32
    return %c0_i32, %c0_i32_0 : i32, i32
  }
  func.func @transform_3(%arg0: i32) -> (i32, i32) {
    %c0_i32 = arith.constant 0 : i32
    %c0_i32_0 = arith.constant 0 : i32
    %c0_i32_1 = arith.constant 0 : i32
    return %c0_i32, %c0_i32_0 : i32, i32
  }
  func.func @transform_4(%arg0: i32) -> (i32, i32) {
    %c0_i32 = arith.constant 0 : i32
    %c0_i32_0 = arith.constant 0 : i32
    %c0_i32_1 = arith.constant 0 : i32
    return %c0_i32, %c0_i32_0 : i32, i32
  }
  func.func @transform_5(%arg0: i32) -> (i32, i32) {
    %c0_i32 = arith.constant 0 : i32
    %c0_i32_0 = arith.constant 0 : i32
    return %arg0, %c0_i32 : i32, i32
  }
}

</mosaic_0001>

<bundles_post_ra>
// kernel: bigst_forward.1
= control target key start
LH: loop header
LB: loop body
LE: loop exit
PB: predicated region body
PF: predicated region fallthrough
CT: control target
= control target key end

     0   :  { %s628_s18 = smov 0   ;;  %s717_s0 = inlined_call_operand.vmem [shape: f32[32,72], index: 0, kind: input, shape index: {}]   ;;  %s718_s1 = inlined_call_operand.vmem [shape: f32[72,76], index: 1, kind: input, shape index: {}]   ;;  %s719_s2 = inlined_call_operand.vmem [shape: f32[1,76], index: 2, kind: input, shape index: {}]   ;;  %s720_s3 = inlined_call_operand.vmem [shape: f32[76,12], index: 3, kind: input, shape index: {}]   ;;  %s721_s4 = inlined_call_operand.vmem [shape: f32[1,12], index: 4, kind: input, shape index: {}]   ;;  %s722_s5 = inlined_call_operand.vmem [shape: f32[32,12], index: 5, kind: output, shape index: {}]  }
   0x1 LB: > { %s497_s19 = sadd.s32 4294967295, %s596_s18   ;;  %p501_p0 = scmp.ge.s32.totalorder %s596_s18, 1  ;;  %s596_s18 = sphi %s628_s18, %s15_s18  }
   0x2   : > { %p188_p1 = scmp.lt.s32.totalorder %s596_s18, 3 }
   0x4   : > { %p189_p2 = pnand %p501_p0, %p188_p1 }
   0x5   : > { %s502_s24 = sshll.u32 (!%p189_p2), %s497_s19, 1 }
   0x6   : > { %192 = sbr.rel (%p189_p2) target bundleno = 429 (0x1ad), region = 40  ;;  %p217_p3 = scmp.lt.s32.totalorder (!%p189_p2), %s502_s24, 3 }
   0xb   : > { %v238_v0 = vld [vmem:[%s718_s1 + $0x40] sm:$0xff]  ;;  %v237_v1 = vld [vmem:[%s718_s1 + $0x38] sm:$0xff]  ;;  %vm359_vm0 = vcmask 1043456   ;;  %v236_v2 = vld [vmem:[%s718_s1 + $0x30] sm:$0xff]  ;;  %s724_s24 = smov (!%p217_p3, %s502_s24), 3  ;;  %vm246_vm1 = vcmask 588800   ;;  %v328_v21 = vlaneseq }
   0xc   : > { %538 = vmatprep.subr.mxu0 %v238_v0  ;;  %v344_v3 = vld [vmem:[%s720_s3 + $0x48] sm:$0xf]  ;;  %v343_v4 = vld [vmem:[%s720_s3 + $0x40] sm:$0xff]  ;;  %s503_s8 = sshll.u32 %s724_s24, 3  ;;  %v342_v7 = vld [vmem:[%s720_s3 + $0x38] sm:$0xff]  ;;  %vm352_vm3 = vcmask 621568  }
   0xd   : > { %539 = vmatpush3.msra.mxu0 %v238_v0  ;;  %v235_v5 = vld [vmem:[%s718_s1 + $0x28] sm:$0xff]  ;;  %559 = vmatprep.subr.msk.mxu1 %vm359_vm0, %v344_v3  ;;  %v234_v6 = vld [vmem:[%s718_s1 + $0x20] sm:$0xff]  ;;  %s220_s13 = scalar_lea.vmem %s717_s0, %s503_s8  ;;  %v233_v9 = vld [vmem:[%s718_s1 + $0x18] sm:$0xff]  ;;  %v329_v25 = vand.u32 127, %v328_v21  ;;  %s226_s23 = scalar_lea.vmem %s722_s5, %s503_s8  ;;  %vm438_vm4 = vcmask 97280  }
   0xe   : > { %540 = vmatprep.subr.mxu0 %v237_v1  ;;  %560 = vmatpush3.msk.msra.mxu1 %vm359_vm0, %v344_v3  ;;  %v228_v8 = vld [vmem:[%s220_s13] sm:$0xff]  ;;  %v341_v10 = vld [vmem:[%s720_s3 + $0x30] sm:$0xff]  ;;  %v340_v12 = vld [vmem:[%s720_s3 + $0x28] sm:$0xff] }
   0xf   : > { %541 = vmatpush3.msra.mxu0 %v237_v1  ;;  %561 = vmatprep.subr.mxu1 %v343_v4  ;;  %v232_v11 = vld [vmem:[%s718_s1 + $0x10] sm:$0xff]  ;;  %v231_v13 = vld [vmem:[%s718_s1 + $0x8] sm:$0xff]  ;;  %v339_v14 = vld [vmem:[%s720_s3 + $0x20] sm:$0xff]  ;;  %vm330_vm2 = vcmp.lt.s32.totalorder %v329_v25, 32 }
  0x10   : > { %542 = vmatprep.subr.mxu0 %v236_v2  ;;  %562 = vmatpush3.msra.mxu1 %v343_v4  ;;  %v230_v15 = vld [vmem:[%s718_s1] sm:$0xff]  ;;  %v229_v16 = vld [vmem:[%s220_s13 + $0x8] sm:$0xff]  ;;  %v338_v17 = vld [vmem:[%s720_s3 + $0x18] sm:$0xff] }
  0x11   : > { %543 = vmatpush3.msra.mxu0 %v236_v2  ;;  %556 = vmatprep.mubr.msk.f32.mxu0 %vm246_vm1, %v228_v8  ;;  %v337_v18 = vld [vmem:[%s720_s3 + $0x10] sm:$0xff]  ;;  %v336_v19 = vld [vmem:[%s720_s3 + $0x8] sm:$0xff]  ;;  %v335_v20 = vld [vmem:[%s720_s3] sm:$0xff] }
  0x12   : > { %544 = vmatprep.subr.mxu0 %v235_v5  ;;  %563 = vmatprep.subr.mxu1 %v342_v7  ;;  %v506_v22 = vld [vmem:[%s719_s2] ss:$0 sm:$0xff] }
  0x13   : > { %545 = vmatpush3.msra.mxu0 %v235_v5  ;;  %564 = vmatpush3.msra.mxu1 %v342_v7  ;;  %v509_v33 = vld [vmem:[%s721_s4] ss:$0 sm:$0xff] }
  0x14   : > { %546 = vmatprep.subr.mxu0 %v234_v6  ;;  %565 = vmatprep.subr.mxu1 %v341_v10 }
  0x15   : > { %547 = vmatpush3.msra.mxu0 %v234_v6  ;;  %566 = vmatpush3.msra.mxu1 %v341_v10 }
  0x16   : > { %548 = vmatprep.subr.mxu0 %v233_v9  ;;  %567 = vmatprep.subr.mxu1 %v340_v12 }
  0x17   : > { %549 = vmatpush3.msra.mxu0 %v233_v9  ;;  %568 = vmatpush3.msra.mxu1 %v340_v12 }
  0x18   : > { %550 = vmatprep.subr.mxu0 %v232_v11  ;;  %569 = vmatprep.subr.mxu1 %v339_v14 }
  0x19   : > { %551 = vmatpush3.msra.mxu0 %v232_v11  ;;  %570 = vmatpush3.msra.mxu1 %v339_v14 }
  0x1a   : > { %552 = vmatprep.subr.mxu0 %v231_v13  ;;  %571 = vmatprep.subr.mxu1 %v338_v17 }
  0x1b   : > { %553 = vmatpush3.msra.mxu0 %v231_v13  ;;  %572 = vmatpush3.msra.mxu1 %v338_v17 }
  0x1c   : > { %554 = vmatprep.subr.mxu0 %v230_v15  ;;  %573 = vmatprep.subr.mxu1 %v337_v18 }
  0x1d   : > { %555 = vmatpush3.msra.mxu0 %v230_v15  ;;  %574 = vmatpush3.msra.mxu1 %v337_v18 }
  0x1e   : > { %557 = vmatmul.mubr.msk.f32.vlgmr.msra.gmra.mxu0 %vm246_vm1, %v229_v16  ;;  %575 = vmatprep.subr.mxu1 %v336_v19 }
  0x1f   : > { %576 = vmatpush3.msra.mxu1 %v336_v19 }
  0x20   : > { %577 = vmatprep.subr.mxu1 %v335_v20 }
  0x21   : > { %578 = vmatpush3.msra.mxu1 %v335_v20 }
  0xde   : > { %v558_v23 = vpop.f32.mrf.mxu0 }
  0xdf   : > { %v325_v24 = vadd.f32 %v558_v23, %v506_v22 }
  0xe0   : > { %v319_v26 = vpop.f32.mrf.mxu0 }
  0xe1   : > { %v320_v27 = vadd.f32 %v506_v22, %v319_v26  ;;  %v332_v28 = vmax.f32 %v325_v24, 0.0 }
  0xe3   : > { %v331_v29 = vmax.f32 %v320_v27, 0.0  ;;  %v334_v31 = vsel %vm330_vm2, %v332_v28, %v325_v24 }
  0xe5   : > { %v333_v30 = vsel %vm330_vm2, %v331_v29, %v320_v27 }
  0xe6   : > { %579 = vmatprep.mubr.msk.f32.mxu1 %vm352_vm3, %v333_v30 }
  0xe7   : > { %580 = vmatmul.mubr.msk.f32.vlgmr.msra.gmra.mxu1 %vm352_vm3, %v334_v31 }
 0x1a7   : > { %v581_v32 = vpop.f32.mrf.mxu1 }
 0x1a8   : > { %v435_v36 = vadd.f32 %v581_v32, %v509_v33 }
 0x1a9   : > { %v429_v34 = vpop.f32.mrf.mxu1 }
 0x1aa   : > { %v430_v35 = vadd.f32 %v509_v33, %v429_v34  ;;  %440 = vst.msk [vmem:[%s226_s23 + $0x8] sm:$0xff] %vm438_vm4, %v435_v36 }
 0x1ac   : > { %439 = vst.msk [vmem:[%s226_s23] sm:$0xff] %vm438_vm4, %v430_v35 }
 0x1ad PF: > { %s15_s18 = sadd.s32 1, %s596_s18  }
 0x1ae   : > { %p12_p4 = scmp.ge.s32.totalorder %s15_s18, 4  }
 0x1b0   :  { %14 = sbr.rel (!%p12_p4) target bundleno = 1 (0x1), region = 70 }

</bundles_post_ra>
